<compile_context>
chip_gen: v5e
topology: v5e:2x2
jax: 0.10.0
libtpu: 0.0.40
codegen_flags: <defaults>
</compile_context>

<pallas_src>
import numpy as np
import jax
import jax.numpy as jnp
from jax import lax
from jax.experimental import pallas as pl
from jax.experimental.pallas import tpu as pltpu

# ---- "config" values implied by the module (small synthetic sizes) ----
VOCAB_SIZE = 50
EMBED_SIZE = 32     # config.embed_size
CELL_SIZE = 32      # config.dec_cell_size
Y_SIZE = 5          # config.y_size
K = 8               # config.k
ACTION_NUM = 16     # config.action_num
B, T = 2, 8         # batch, sequence length

LANES = 128                       # lane-pad every minor dim to 128
H = CELL_SIZE
TB = T * B
YK = Y_SIZE * K

# ---- packed parameter slab layout (row offsets are multiples of 8) ----
R_EMBWIH = 0                      # (128, 128): rows 0..V-1 = emb @ W_ih (cols 0..3H-1)
R_WHH = R_EMBWIH + LANES          # (32, 128):  W_hh (cols 0..3H-1)
R_BIAS = R_WHH + H                # (8, 128):   row 0 b_ih, row 1 b_hh, row 2 b_qy
R_WQY = R_BIAS + 8                # (32, 128):  W_qy (cols 0..Y*K-1)
SLAB_ROWS = R_WQY + H             # 200 rows -> ~100 KiB f32


# -------------------- fused Pallas kernel --------------------

def action_encoder_kernel(tok_ref, slab_ref, logq_ref):
    """One-hot gather(+folded input proj) + GRU + q_y + grouped log_softmax.

    tok_ref:  (T*B, 1) int32, time-major flattened tokens (row t*B + b = tokens[b, t])
    slab_ref: (SLAB_ROWS, 128) f32 packed parameters (see layout above)
    logq_ref: (B, 128) f32; lanes [0, Y*K) hold the per-group log_softmax,
              pad lanes are 0 (single unmasked lane-dense store)
    """
    # ---- tile-aligned static views into the packed slab (one DMA'd input) ----
    emb_wih = slab_ref[R_EMBWIH:R_EMBWIH + LANES, :]        # (128, 128)
    w_hh = slab_ref[R_WHH:R_WHH + H, :]                     # (32, 128)
    biases = slab_ref[R_BIAS:R_BIAS + 8, :]                 # (8, 128) one aligned load
    w_qy = slab_ref[R_WQY:R_WQY + H, :]                     # (32, 128)
    b_ih = biases[0:1, :]                                   # (1, 128)
    b_hh = biases[1:2, :]
    b_qy = biases[2:3, :]

    # ---- embedding gather fused with input projection: one MXU matmul ----
    # onehot @ (emb @ W_ih)  ==  (onehot @ emb) @ W_ih
    vocab_iota = lax.broadcasted_iota(jnp.int32, (TB, LANES), 1)
    onehot = (tok_ref[...] == vocab_iota).astype(jnp.float32)          # (T*B, 128)
    gi_all = jnp.dot(onehot, emb_wih,
                     preferred_element_type=jnp.float32) + b_ih        # (T*B, 128)

    # ---- GRU recurrence (PyTorch gate order r, z, n), h in registers ----
    bhh = jnp.broadcast_to(b_hh, (B, LANES))                # hoisted broadcast
    h = jnp.zeros((B, H), jnp.float32)
    for t in range(T):                                      # static unroll (T=8)
        gi = gi_all[t * B:(t + 1) * B, :]                   # (B, 128)
        gh = jnp.dot(h, w_hh, preferred_element_type=jnp.float32) + bhh
        rz = jax.nn.sigmoid(gi[:, :2 * H] + gh[:, :2 * H])  # fused r/z sigmoid
        r = rz[:, :H]
        z = rz[:, H:2 * H]
        n = jnp.tanh(gi[:, 2 * H:3 * H] + r * gh[:, 2 * H:3 * H])
        h = (1.0 - z) * n + z * h

    # ---- q_y linear (lane-padded to 128; pad cols of W/b are zero) ----
    logits = jnp.dot(h, w_qy, preferred_element_type=jnp.float32) + b_qy   # (B, 128)

    # ---- per-k-group log_softmax, numerically stable (per-group logsumexp) ----
    # Build a dense (B, 128) logsumexp-broadcast with lane masks, then do a
    # single full-width store.  Pad lanes: logits==0 and lse_b==0 -> logq==0.
    lane = lax.broadcasted_iota(jnp.int32, (B, LANES), 1)
    lse_b = jnp.zeros((B, LANES), jnp.float32)
    for y in range(Y_SIZE):                                 # Y small, static
        sl = logits[:, y * K:(y + 1) * K]                   # (B, K)
        m = jnp.max(sl, axis=-1, keepdims=True)             # per-GROUP max (stable)
        lse = m + jnp.log(jnp.sum(jnp.exp(sl - m), axis=-1, keepdims=True))
        in_grp = (lane >= y * K) & (lane < (y + 1) * K)
        lse_b = jnp.where(in_grp, lse, lse_b)
    logq_ref[...] = logits - lse_b                          # one dense 128-lane store


# -------------------- wrappers --------------------

def pack_params(emb_table, w_ih, w_hh, b_ih, b_hh, w_qy, b_qy):
    """Build the single lane-aligned parameter slab once on the host."""
    slab = np.zeros((SLAB_ROWS, LANES), np.float32)
    emb_wih = np.asarray(emb_table, np.float32) @ np.asarray(w_ih, np.float32)
    slab[R_EMBWIH:R_EMBWIH + VOCAB_SIZE, 0:3 * H] = emb_wih
    slab[R_WHH:R_WHH + H, 0:3 * H] = np.asarray(w_hh, np.float32)
    slab[R_BIAS + 0, 0:3 * H] = np.asarray(b_ih, np.float32).reshape(-1)
    slab[R_BIAS + 1, 0:3 * H] = np.asarray(b_hh, np.float32).reshape(-1)
    slab[R_BIAS + 2, 0:YK] = np.asarray(b_qy, np.float32).reshape(-1)
    slab[R_WQY:R_WQY + H, 0:YK] = np.asarray(w_qy, np.float32)
    return jnp.asarray(slab)


def _run_fused(tokens_tb, slab):
    return pl.pallas_call(
        action_encoder_kernel,
        out_shape=jax.ShapeDtypeStruct((B, LANES), jnp.float32),
        in_specs=[pl.BlockSpec(memory_space=pltpu.MemorySpace.VMEM),
                  pl.BlockSpec(memory_space=pltpu.MemorySpace.VMEM)],
        out_specs=pl.BlockSpec(memory_space=pltpu.MemorySpace.VMEM),
        cost_estimate=pl.CostEstimate(flops=672_000, transcendentals=1_700,
                                      bytes_accessed=103_500),
    )(tokens_tb, slab)


@jax.jit
def _device_forward(tokens, slab):
    # time-major flatten: row t*B + b = tokens[b, t]  (tiny int reshape, fused under jit)
    tokens_tb = jnp.transpose(tokens).reshape(TB, 1).astype(jnp.int32)
    logq_pad = _run_fused(tokens_tb, slab)                  # (B, 128)
    log_qy = logq_pad[:, :YK].reshape(B, Y_SIZE, K)
    # first-occurrence argmax == the original loop-break semantics (exp is monotone)
    codes = jnp.argmax(log_qy, axis=-1).astype(jnp.int32)   # (B, Y)
    return log_qy, codes


def action_encoder_forward(tokens, slab, name2action):
    """Mirrors ActionEncoder.forward (returns action_list, action_name_list)."""
    log_qy, code_idx = _device_forward(tokens, slab)

    # Only B*Y int32 argmax indices are needed on the host.
    codes = np.asarray(code_idx)                            # (B, Y) int32

    # TODO(synk): the final string-code -> name2action dict lookup is host-side
    # Python (no Pallas equivalent); only the argmax indices leave the device.
    action_list, action_name_list = [], []
    for b_id in range(tokens.shape[0]):
        code = '-'.join(str(int(codes[b_id, y_id])) for y_id in range(Y_SIZE))
        action_id = name2action.get(code, ACTION_NUM - 1)
        action_name_list.append(code)
        action_list.append(action_id)
    return action_list, action_name_list, log_qy, codes


# -------------------- pure-JAX reference (for validation) --------------------

def reference_log_qy(tokens, params):
    emb_table, w_ih, w_hh, b_ih, b_hh, w_qy, b_qy = params
    x_emb = jnp.take(emb_table, tokens, axis=0)          # (B, T, E)
    h = jnp.zeros((B, CELL_SIZE), jnp.float32)
    for t in range(T):
        x_t = x_emb[:, t, :]
        gi = x_t @ w_ih + b_ih
        gh = h @ w_hh + b_hh
        r = jax.nn.sigmoid(gi[:, 0:H] + gh[:, 0:H])
        z = jax.nn.sigmoid(gi[:, H:2 * H] + gh[:, H:2 * H])
        n = jnp.tanh(gi[:, 2 * H:3 * H] + r * gh[:, 2 * H:3 * H])
        h = (1.0 - z) * n + z * h
    logits = (h @ w_qy + b_qy).reshape(B * Y_SIZE, K)
    log_qy = jax.nn.log_softmax(logits, axis=1)
    return log_qy.reshape(B, Y_SIZE, K)


# -------------------- main --------------------

if __name__ == "__main__":
    key = jax.random.PRNGKey(0)
    ks = jax.random.split(key, 8)

    # deterministic synthetic parameters (shapes from ActionEncoder.__init__)
    emb_table = jax.random.normal(ks[0], (VOCAB_SIZE, EMBED_SIZE), jnp.float32) * 0.1
    w_ih = jax.random.normal(ks[1], (EMBED_SIZE, 3 * CELL_SIZE), jnp.float32) * 0.1
    w_hh = jax.random.normal(ks[2], (CELL_SIZE, 3 * CELL_SIZE), jnp.float32) * 0.1
    b_ih = jax.random.normal(ks[3], (1, 3 * CELL_SIZE), jnp.float32) * 0.1
    b_hh = jax.random.normal(ks[4], (1, 3 * CELL_SIZE), jnp.float32) * 0.1
    w_qy = jax.random.normal(ks[5], (CELL_SIZE, Y_SIZE * K), jnp.float32) * 0.1
    b_qy = jax.random.normal(ks[6], (1, Y_SIZE * K), jnp.float32) * 0.1
    params = (emb_table, w_ih, w_hh, b_ih, b_hh, w_qy, b_qy)

    # one-time host-side packing of all params into a single lane-aligned slab
    slab = pack_params(*params)

    tokens = jax.random.randint(ks[7], (B, T), 0, VOCAB_SIZE, jnp.int32)

    # synthetic name2action mapping (ActionEncoder takes this as a ctor arg)
    name2action = {'-'.join(['0'] * Y_SIZE): 0, '-'.join(['1'] * Y_SIZE): 1}

    action_list, action_name_list, log_qy, codes = action_encoder_forward(
        tokens, slab, name2action)
    log_qy = jax.block_until_ready(log_qy)

    ref = jax.block_until_ready(reference_log_qy(tokens, params))
    assert np.allclose(np.asarray(log_qy), np.asarray(ref), atol=1e-4), \
        "Pallas log_qy mismatch vs JAX reference"
    ref_codes = np.argmax(np.asarray(ref), axis=-1)
    assert np.array_equal(codes, ref_codes), "Pallas argmax mismatch vs reference"
    assert len(action_list) == B and len(action_name_list) == B

    print("KERNEL_OK")
</pallas_src>

<mosaic_0001>
module attributes {stable_mosaic.version = 11 : i64} {
  func.func @action_encoder_kernel(%arg0: memref<16x1xi32, #tpu.memory_space<vmem>>, %arg1: memref<200x128xf32, #tpu.memory_space<vmem>>, %arg2: memref<2x128xf32, #tpu.memory_space<vmem>>) attributes {dimension_semantics = [], scalar_prefetch = 0 : i64, scratch_operands = 0 : i64, tpu.core_type = #tpu.core_type<tc>} {
    %c0 = arith.constant 0 : index
    %c0_0 = arith.constant 0 : index
    %0 = vector.load %arg1[%c0, %c0_0] : memref<200x128xf32, #tpu.memory_space<vmem>>, vector<128x128xf32>
    %c128 = arith.constant 128 : index
    %c0_1 = arith.constant 0 : index
    %1 = vector.load %arg1[%c128, %c0_1] : memref<200x128xf32, #tpu.memory_space<vmem>>, vector<32x128xf32>
    %c160 = arith.constant 160 : index
    %c0_2 = arith.constant 0 : index
    %2 = vector.load %arg1[%c160, %c0_2] : memref<200x128xf32, #tpu.memory_space<vmem>>, vector<8x128xf32>
    %c168 = arith.constant 168 : index
    %c0_3 = arith.constant 0 : index
    %3 = vector.load %arg1[%c168, %c0_3] : memref<200x128xf32, #tpu.memory_space<vmem>>, vector<32x128xf32>
    %4 = vector.extract_strided_slice %2 {offsets = [0, 0], sizes = [1, 128], strides = [1, 1]} : vector<8x128xf32> to vector<1x128xf32>
    %5 = vector.extract_strided_slice %2 {offsets = [1, 0], sizes = [1, 128], strides = [1, 1]} : vector<8x128xf32> to vector<1x128xf32>
    %6 = vector.extract_strided_slice %2 {offsets = [2, 0], sizes = [1, 128], strides = [1, 1]} : vector<8x128xf32> to vector<1x128xf32>
    %7 = tpu.iota {dimensions = array<i32: 1>} : vector<16x128xi32>
    %c0_4 = arith.constant 0 : index
    %c0_5 = arith.constant 0 : index
    %8 = vector.load %arg0[%c0_4, %c0_5] : memref<16x1xi32, #tpu.memory_space<vmem>>, vector<16x1xi32>
    %9 = vector.broadcast %8 : vector<16x1xi32> to vector<16x128xi32>
    %10 = arith.cmpi eq, %9, %7 : vector<16x128xi32>
    %11 = arith.extui %10 : vector<16x128xi1> to vector<16x128xi32>
    %12 = arith.sitofp %11 : vector<16x128xi32> to vector<16x128xf32>
    %cst = arith.constant dense<0.000000e+00> : vector<16x128xf32>
    %13 = tpu.matmul %12, %0, %cst {dimension_numbers = #tpu.dot_dimension_numbers<[1], [0], [0], [1], [0, 0, 1, 1], [], []>} : vector<16x128xf32>, vector<128x128xf32>, vector<16x128xf32> -> vector<16x128xf32>
    %14 = vector.broadcast %4 : vector<1x128xf32> to vector<16x128xf32>
    %15 = arith.addf %13, %14 : vector<16x128xf32>
    %16 = vector.shape_cast %5 : vector<1x128xf32> to vector<1x128xf32>
    %17 = vector.broadcast %16 : vector<1x128xf32> to vector<2x128xf32>
    %cst_6 = arith.constant 0.000000e+00 : f32
    %18 = vector.broadcast %cst_6 : f32 to vector<2x32xf32>
    %19 = vector.extract_strided_slice %15 {offsets = [0, 0], sizes = [2, 128], strides = [1, 1]} : vector<16x128xf32> to vector<2x128xf32>
    %cst_7 = arith.constant dense<0.000000e+00> : vector<2x128xf32>
    %20 = tpu.matmul %18, %1, %cst_7 {dimension_numbers = #tpu.dot_dimension_numbers<[1], [0], [0], [1], [0, 0, 1, 1], [], []>} : vector<2x32xf32>, vector<32x128xf32>, vector<2x128xf32> -> vector<2x128xf32>
    %21 = arith.addf %20, %17 : vector<2x128xf32>
    %22 = vector.extract_strided_slice %19 {offsets = [0, 0], sizes = [2, 64], strides = [1, 1]} : vector<2x128xf32> to vector<2x64xf32>
    %23 = vector.extract_strided_slice %21 {offsets = [0, 0], sizes = [2, 64], strides = [1, 1]} : vector<2x128xf32> to vector<2x64xf32>
    %24 = arith.addf %22, %23 : vector<2x64xf32>
    %25 = arith.negf %24 : vector<2x64xf32>
    %26 = math.exp %25 : vector<2x64xf32>
    %cst_8 = arith.constant 1.000000e+00 : f32
    %27 = vector.broadcast %cst_8 : f32 to vector<2x64xf32>
    %28 = arith.addf %27, %26 : vector<2x64xf32>
    %29 = arith.divf %27, %28 : vector<2x64xf32>
    %30 = vector.extract_strided_slice %29 {offsets = [0, 0], sizes = [2, 32], strides = [1, 1]} : vector<2x64xf32> to vector<2x32xf32>
    %31 = vector.extract_strided_slice %29 {offsets = [0, 32], sizes = [2, 32], strides = [1, 1]} : vector<2x64xf32> to vector<2x32xf32>
    %32 = vector.extract_strided_slice %19 {offsets = [0, 64], sizes = [2, 32], strides = [1, 1]} : vector<2x128xf32> to vector<2x32xf32>
    %33 = vector.extract_strided_slice %21 {offsets = [0, 64], sizes = [2, 32], strides = [1, 1]} : vector<2x128xf32> to vector<2x32xf32>
    %34 = arith.mulf %30, %33 : vector<2x32xf32>
    %35 = arith.addf %32, %34 : vector<2x32xf32>
    %36 = math.tanh %35 : vector<2x32xf32>
    %cst_9 = arith.constant 1.000000e+00 : f32
    %37 = vector.broadcast %cst_9 : f32 to vector<2x32xf32>
    %38 = arith.subf %37, %31 : vector<2x32xf32>
    %39 = arith.mulf %38, %36 : vector<2x32xf32>
    %40 = arith.mulf %31, %18 : vector<2x32xf32>
    %41 = arith.addf %39, %40 : vector<2x32xf32>
    %42 = vector.extract_strided_slice %15 {offsets = [2, 0], sizes = [2, 128], strides = [1, 1]} : vector<16x128xf32> to vector<2x128xf32>
    %cst_10 = arith.constant dense<0.000000e+00> : vector<2x128xf32>
    %43 = tpu.matmul %41, %1, %cst_10 {dimension_numbers = #tpu.dot_dimension_numbers<[1], [0], [0], [1], [0, 0, 1, 1], [], []>} : vector<2x32xf32>, vector<32x128xf32>, vector<2x128xf32> -> vector<2x128xf32>
    %44 = arith.addf %43, %17 : vector<2x128xf32>
    %45 = vector.extract_strided_slice %42 {offsets = [0, 0], sizes = [2, 64], strides = [1, 1]} : vector<2x128xf32> to vector<2x64xf32>
    %46 = vector.extract_strided_slice %44 {offsets = [0, 0], sizes = [2, 64], strides = [1, 1]} : vector<2x128xf32> to vector<2x64xf32>
    %47 = arith.addf %45, %46 : vector<2x64xf32>
    %48 = arith.negf %47 : vector<2x64xf32>
    %49 = math.exp %48 : vector<2x64xf32>
    %cst_11 = arith.constant 1.000000e+00 : f32
    %50 = vector.broadcast %cst_11 : f32 to vector<2x64xf32>
    %51 = arith.addf %50, %49 : vector<2x64xf32>
    %52 = arith.divf %50, %51 : vector<2x64xf32>
    %53 = vector.extract_strided_slice %52 {offsets = [0, 0], sizes = [2, 32], strides = [1, 1]} : vector<2x64xf32> to vector<2x32xf32>
    %54 = vector.extract_strided_slice %52 {offsets = [0, 32], sizes = [2, 32], strides = [1, 1]} : vector<2x64xf32> to vector<2x32xf32>
    %55 = vector.extract_strided_slice %42 {offsets = [0, 64], sizes = [2, 32], strides = [1, 1]} : vector<2x128xf32> to vector<2x32xf32>
    %56 = vector.extract_strided_slice %44 {offsets = [0, 64], sizes = [2, 32], strides = [1, 1]} : vector<2x128xf32> to vector<2x32xf32>
    %57 = arith.mulf %53, %56 : vector<2x32xf32>
    %58 = arith.addf %55, %57 : vector<2x32xf32>
    %59 = math.tanh %58 : vector<2x32xf32>
    %cst_12 = arith.constant 1.000000e+00 : f32
    %60 = vector.broadcast %cst_12 : f32 to vector<2x32xf32>
    %61 = arith.subf %60, %54 : vector<2x32xf32>
    %62 = arith.mulf %61, %59 : vector<2x32xf32>
    %63 = arith.mulf %54, %41 : vector<2x32xf32>
    %64 = arith.addf %62, %63 : vector<2x32xf32>
    %65 = vector.extract_strided_slice %15 {offsets = [4, 0], sizes = [2, 128], strides = [1, 1]} : vector<16x128xf32> to vector<2x128xf32>
    %cst_13 = arith.constant dense<0.000000e+00> : vector<2x128xf32>
    %66 = tpu.matmul %64, %1, %cst_13 {dimension_numbers = #tpu.dot_dimension_numbers<[1], [0], [0], [1], [0, 0, 1, 1], [], []>} : vector<2x32xf32>, vector<32x128xf32>, vector<2x128xf32> -> vector<2x128xf32>
    %67 = arith.addf %66, %17 : vector<2x128xf32>
    %68 = vector.extract_strided_slice %65 {offsets = [0, 0], sizes = [2, 64], strides = [1, 1]} : vector<2x128xf32> to vector<2x64xf32>
    %69 = vector.extract_strided_slice %67 {offsets = [0, 0], sizes = [2, 64], strides = [1, 1]} : vector<2x128xf32> to vector<2x64xf32>
    %70 = arith.addf %68, %69 : vector<2x64xf32>
    %71 = arith.negf %70 : vector<2x64xf32>
    %72 = math.exp %71 : vector<2x64xf32>
    %cst_14 = arith.constant 1.000000e+00 : f32
    %73 = vector.broadcast %cst_14 : f32 to vector<2x64xf32>
    %74 = arith.addf %73, %72 : vector<2x64xf32>
    %75 = arith.divf %73, %74 : vector<2x64xf32>
    %76 = vector.extract_strided_slice %75 {offsets = [0, 0], sizes = [2, 32], strides = [1, 1]} : vector<2x64xf32> to vector<2x32xf32>
    %77 = vector.extract_strided_slice %75 {offsets = [0, 32], sizes = [2, 32], strides = [1, 1]} : vector<2x64xf32> to vector<2x32xf32>
    %78 = vector.extract_strided_slice %65 {offsets = [0, 64], sizes = [2, 32], strides = [1, 1]} : vector<2x128xf32> to vector<2x32xf32>
    %79 = vector.extract_strided_slice %67 {offsets = [0, 64], sizes = [2, 32], strides = [1, 1]} : vector<2x128xf32> to vector<2x32xf32>
    %80 = arith.mulf %76, %79 : vector<2x32xf32>
    %81 = arith.addf %78, %80 : vector<2x32xf32>
    %82 = math.tanh %81 : vector<2x32xf32>
    %cst_15 = arith.constant 1.000000e+00 : f32
    %83 = vector.broadcast %cst_15 : f32 to vector<2x32xf32>
    %84 = arith.subf %83, %77 : vector<2x32xf32>
    %85 = arith.mulf %84, %82 : vector<2x32xf32>
    %86 = arith.mulf %77, %64 : vector<2x32xf32>
    %87 = arith.addf %85, %86 : vector<2x32xf32>
    %88 = vector.extract_strided_slice %15 {offsets = [6, 0], sizes = [2, 128], strides = [1, 1]} : vector<16x128xf32> to vector<2x128xf32>
    %cst_16 = arith.constant dense<0.000000e+00> : vector<2x128xf32>
    %89 = tpu.matmul %87, %1, %cst_16 {dimension_numbers = #tpu.dot_dimension_numbers<[1], [0], [0], [1], [0, 0, 1, 1], [], []>} : vector<2x32xf32>, vector<32x128xf32>, vector<2x128xf32> -> vector<2x128xf32>
    %90 = arith.addf %89, %17 : vector<2x128xf32>
    %91 = vector.extract_strided_slice %88 {offsets = [0, 0], sizes = [2, 64], strides = [1, 1]} : vector<2x128xf32> to vector<2x64xf32>
    %92 = vector.extract_strided_slice %90 {offsets = [0, 0], sizes = [2, 64], strides = [1, 1]} : vector<2x128xf32> to vector<2x64xf32>
    %93 = arith.addf %91, %92 : vector<2x64xf32>
    %94 = arith.negf %93 : vector<2x64xf32>
    %95 = math.exp %94 : vector<2x64xf32>
    %cst_17 = arith.constant 1.000000e+00 : f32
    %96 = vector.broadcast %cst_17 : f32 to vector<2x64xf32>
    %97 = arith.addf %96, %95 : vector<2x64xf32>
    %98 = arith.divf %96, %97 : vector<2x64xf32>
    %99 = vector.extract_strided_slice %98 {offsets = [0, 0], sizes = [2, 32], strides = [1, 1]} : vector<2x64xf32> to vector<2x32xf32>
    %100 = vector.extract_strided_slice %98 {offsets = [0, 32], sizes = [2, 32], strides = [1, 1]} : vector<2x64xf32> to vector<2x32xf32>
    %101 = vector.extract_strided_slice %88 {offsets = [0, 64], sizes = [2, 32], strides = [1, 1]} : vector<2x128xf32> to vector<2x32xf32>
    %102 = vector.extract_strided_slice %90 {offsets = [0, 64], sizes = [2, 32], strides = [1, 1]} : vector<2x128xf32> to vector<2x32xf32>
    %103 = arith.mulf %99, %102 : vector<2x32xf32>
    %104 = arith.addf %101, %103 : vector<2x32xf32>
    %105 = math.tanh %104 : vector<2x32xf32>
    %cst_18 = arith.constant 1.000000e+00 : f32
    %106 = vector.broadcast %cst_18 : f32 to vector<2x32xf32>
    %107 = arith.subf %106, %100 : vector<2x32xf32>
    %108 = arith.mulf %107, %105 : vector<2x32xf32>
    %109 = arith.mulf %100, %87 : vector<2x32xf32>
    %110 = arith.addf %108, %109 : vector<2x32xf32>
    %111 = vector.extract_strided_slice %15 {offsets = [8, 0], sizes = [2, 128], strides = [1, 1]} : vector<16x128xf32> to vector<2x128xf32>
    %cst_19 = arith.constant dense<0.000000e+00> : vector<2x128xf32>
    %112 = tpu.matmul %110, %1, %cst_19 {dimension_numbers = #tpu.dot_dimension_numbers<[1], [0], [0], [1], [0, 0, 1, 1], [], []>} : vector<2x32xf32>, vector<32x128xf32>, vector<2x128xf32> -> vector<2x128xf32>
    %113 = arith.addf %112, %17 : vector<2x128xf32>
    %114 = vector.extract_strided_slice %111 {offsets = [0, 0], sizes = [2, 64], strides = [1, 1]} : vector<2x128xf32> to vector<2x64xf32>
    %115 = vector.extract_strided_slice %113 {offsets = [0, 0], sizes = [2, 64], strides = [1, 1]} : vector<2x128xf32> to vector<2x64xf32>
    %116 = arith.addf %114, %115 : vector<2x64xf32>
    %117 = arith.negf %116 : vector<2x64xf32>
    %118 = math.exp %117 : vector<2x64xf32>
    %cst_20 = arith.constant 1.000000e+00 : f32
    %119 = vector.broadcast %cst_20 : f32 to vector<2x64xf32>
    %120 = arith.addf %119, %118 : vector<2x64xf32>
    %121 = arith.divf %119, %120 : vector<2x64xf32>
    %122 = vector.extract_strided_slice %121 {offsets = [0, 0], sizes = [2, 32], strides = [1, 1]} : vector<2x64xf32> to vector<2x32xf32>
    %123 = vector.extract_strided_slice %121 {offsets = [0, 32], sizes = [2, 32], strides = [1, 1]} : vector<2x64xf32> to vector<2x32xf32>
    %124 = vector.extract_strided_slice %111 {offsets = [0, 64], sizes = [2, 32], strides = [1, 1]} : vector<2x128xf32> to vector<2x32xf32>
    %125 = vector.extract_strided_slice %113 {offsets = [0, 64], sizes = [2, 32], strides = [1, 1]} : vector<2x128xf32> to vector<2x32xf32>
    %126 = arith.mulf %122, %125 : vector<2x32xf32>
    %127 = arith.addf %124, %126 : vector<2x32xf32>
    %128 = math.tanh %127 : vector<2x32xf32>
    %cst_21 = arith.constant 1.000000e+00 : f32
    %129 = vector.broadcast %cst_21 : f32 to vector<2x32xf32>
    %130 = arith.subf %129, %123 : vector<2x32xf32>
    %131 = arith.mulf %130, %128 : vector<2x32xf32>
    %132 = arith.mulf %123, %110 : vector<2x32xf32>
    %133 = arith.addf %131, %132 : vector<2x32xf32>
    %134 = vector.extract_strided_slice %15 {offsets = [10, 0], sizes = [2, 128], strides = [1, 1]} : vector<16x128xf32> to vector<2x128xf32>
    %cst_22 = arith.constant dense<0.000000e+00> : vector<2x128xf32>
    %135 = tpu.matmul %133, %1, %cst_22 {dimension_numbers = #tpu.dot_dimension_numbers<[1], [0], [0], [1], [0, 0, 1, 1], [], []>} : vector<2x32xf32>, vector<32x128xf32>, vector<2x128xf32> -> vector<2x128xf32>
    %136 = arith.addf %135, %17 : vector<2x128xf32>
    %137 = vector.extract_strided_slice %134 {offsets = [0, 0], sizes = [2, 64], strides = [1, 1]} : vector<2x128xf32> to vector<2x64xf32>
    %138 = vector.extract_strided_slice %136 {offsets = [0, 0], sizes = [2, 64], strides = [1, 1]} : vector<2x128xf32> to vector<2x64xf32>
    %139 = arith.addf %137, %138 : vector<2x64xf32>
    %140 = arith.negf %139 : vector<2x64xf32>
    %141 = math.exp %140 : vector<2x64xf32>
    %cst_23 = arith.constant 1.000000e+00 : f32
    %142 = vector.broadcast %cst_23 : f32 to vector<2x64xf32>
    %143 = arith.addf %142, %141 : vector<2x64xf32>
    %144 = arith.divf %142, %143 : vector<2x64xf32>
    %145 = vector.extract_strided_slice %144 {offsets = [0, 0], sizes = [2, 32], strides = [1, 1]} : vector<2x64xf32> to vector<2x32xf32>
    %146 = vector.extract_strided_slice %144 {offsets = [0, 32], sizes = [2, 32], strides = [1, 1]} : vector<2x64xf32> to vector<2x32xf32>
    %147 = vector.extract_strided_slice %134 {offsets = [0, 64], sizes = [2, 32], strides = [1, 1]} : vector<2x128xf32> to vector<2x32xf32>
    %148 = vector.extract_strided_slice %136 {offsets = [0, 64], sizes = [2, 32], strides = [1, 1]} : vector<2x128xf32> to vector<2x32xf32>
    %149 = arith.mulf %145, %148 : vector<2x32xf32>
    %150 = arith.addf %147, %149 : vector<2x32xf32>
    %151 = math.tanh %150 : vector<2x32xf32>
    %cst_24 = arith.constant 1.000000e+00 : f32
    %152 = vector.broadcast %cst_24 : f32 to vector<2x32xf32>
    %153 = arith.subf %152, %146 : vector<2x32xf32>
    %154 = arith.mulf %153, %151 : vector<2x32xf32>
    %155 = arith.mulf %146, %133 : vector<2x32xf32>
    %156 = arith.addf %154, %155 : vector<2x32xf32>
    %157 = vector.extract_strided_slice %15 {offsets = [12, 0], sizes = [2, 128], strides = [1, 1]} : vector<16x128xf32> to vector<2x128xf32>
    %cst_25 = arith.constant dense<0.000000e+00> : vector<2x128xf32>
    %158 = tpu.matmul %156, %1, %cst_25 {dimension_numbers = #tpu.dot_dimension_numbers<[1], [0], [0], [1], [0, 0, 1, 1], [], []>} : vector<2x32xf32>, vector<32x128xf32>, vector<2x128xf32> -> vector<2x128xf32>
    %159 = arith.addf %158, %17 : vector<2x128xf32>
    %160 = vector.extract_strided_slice %157 {offsets = [0, 0], sizes = [2, 64], strides = [1, 1]} : vector<2x128xf32> to vector<2x64xf32>
    %161 = vector.extract_strided_slice %159 {offsets = [0, 0], sizes = [2, 64], strides = [1, 1]} : vector<2x128xf32> to vector<2x64xf32>
    %162 = arith.addf %160, %161 : vector<2x64xf32>
    %163 = arith.negf %162 : vector<2x64xf32>
    %164 = math.exp %163 : vector<2x64xf32>
    %cst_26 = arith.constant 1.000000e+00 : f32
    %165 = vector.broadcast %cst_26 : f32 to vector<2x64xf32>
    %166 = arith.addf %165, %164 : vector<2x64xf32>
    %167 = arith.divf %165, %166 : vector<2x64xf32>
    %168 = vector.extract_strided_slice %167 {offsets = [0, 0], sizes = [2, 32], strides = [1, 1]} : vector<2x64xf32> to vector<2x32xf32>
    %169 = vector.extract_strided_slice %167 {offsets = [0, 32], sizes = [2, 32], strides = [1, 1]} : vector<2x64xf32> to vector<2x32xf32>
    %170 = vector.extract_strided_slice %157 {offsets = [0, 64], sizes = [2, 32], strides = [1, 1]} : vector<2x128xf32> to vector<2x32xf32>
    %171 = vector.extract_strided_slice %159 {offsets = [0, 64], sizes = [2, 32], strides = [1, 1]} : vector<2x128xf32> to vector<2x32xf32>
    %172 = arith.mulf %168, %171 : vector<2x32xf32>
    %173 = arith.addf %170, %172 : vector<2x32xf32>
    %174 = math.tanh %173 : vector<2x32xf32>
    %cst_27 = arith.constant 1.000000e+00 : f32
    %175 = vector.broadcast %cst_27 : f32 to vector<2x32xf32>
    %176 = arith.subf %175, %169 : vector<2x32xf32>
    %177 = arith.mulf %176, %174 : vector<2x32xf32>
    %178 = arith.mulf %169, %156 : vector<2x32xf32>
    %179 = arith.addf %177, %178 : vector<2x32xf32>
    %180 = vector.extract_strided_slice %15 {offsets = [14, 0], sizes = [2, 128], strides = [1, 1]} : vector<16x128xf32> to vector<2x128xf32>
    %cst_28 = arith.constant dense<0.000000e+00> : vector<2x128xf32>
    %181 = tpu.matmul %179, %1, %cst_28 {dimension_numbers = #tpu.dot_dimension_numbers<[1], [0], [0], [1], [0, 0, 1, 1], [], []>} : vector<2x32xf32>, vector<32x128xf32>, vector<2x128xf32> -> vector<2x128xf32>
    %182 = arith.addf %181, %17 : vector<2x128xf32>
    %183 = vector.extract_strided_slice %180 {offsets = [0, 0], sizes = [2, 64], strides = [1, 1]} : vector<2x128xf32> to vector<2x64xf32>
    %184 = vector.extract_strided_slice %182 {offsets = [0, 0], sizes = [2, 64], strides = [1, 1]} : vector<2x128xf32> to vector<2x64xf32>
    %185 = arith.addf %183, %184 : vector<2x64xf32>
    %186 = arith.negf %185 : vector<2x64xf32>
    %187 = math.exp %186 : vector<2x64xf32>
    %cst_29 = arith.constant 1.000000e+00 : f32
    %188 = vector.broadcast %cst_29 : f32 to vector<2x64xf32>
    %189 = arith.addf %188, %187 : vector<2x64xf32>
    %190 = arith.divf %188, %189 : vector<2x64xf32>
    %191 = vector.extract_strided_slice %190 {offsets = [0, 0], sizes = [2, 32], strides = [1, 1]} : vector<2x64xf32> to vector<2x32xf32>
    %192 = vector.extract_strided_slice %190 {offsets = [0, 32], sizes = [2, 32], strides = [1, 1]} : vector<2x64xf32> to vector<2x32xf32>
    %193 = vector.extract_strided_slice %180 {offsets = [0, 64], sizes = [2, 32], strides = [1, 1]} : vector<2x128xf32> to vector<2x32xf32>
    %194 = vector.extract_strided_slice %182 {offsets = [0, 64], sizes = [2, 32], strides = [1, 1]} : vector<2x128xf32> to vector<2x32xf32>
    %195 = arith.mulf %191, %194 : vector<2x32xf32>
    %196 = arith.addf %193, %195 : vector<2x32xf32>
    %197 = math.tanh %196 : vector<2x32xf32>
    %cst_30 = arith.constant 1.000000e+00 : f32
    %198 = vector.broadcast %cst_30 : f32 to vector<2x32xf32>
    %199 = arith.subf %198, %192 : vector<2x32xf32>
    %200 = arith.mulf %199, %197 : vector<2x32xf32>
    %201 = arith.mulf %192, %179 : vector<2x32xf32>
    %202 = arith.addf %200, %201 : vector<2x32xf32>
    %cst_31 = arith.constant dense<0.000000e+00> : vector<2x128xf32>
    %203 = tpu.matmul %202, %3, %cst_31 {dimension_numbers = #tpu.dot_dimension_numbers<[1], [0], [0], [1], [0, 0, 1, 1], [], []>} : vector<2x32xf32>, vector<32x128xf32>, vector<2x128xf32> -> vector<2x128xf32>
    %204 = vector.broadcast %6 : vector<1x128xf32> to vector<2x128xf32>
    %205 = arith.addf %203, %204 : vector<2x128xf32>
    %206 = tpu.iota {dimensions = array<i32: 1>} : vector<2x128xi32>
    %cst_32 = arith.constant 0.000000e+00 : f32
    %207 = vector.broadcast %cst_32 : f32 to vector<2x128xf32>
    %208 = vector.extract_strided_slice %205 {offsets = [0, 0], sizes = [2, 8], strides = [1, 1]} : vector<2x128xf32> to vector<2x8xf32>
    %cst_33 = arith.constant dense<0xFF800000> : vector<2xf32>
    %209 = vector.multi_reduction <maximumf>, %208, %cst_33 [1] : vector<2x8xf32> to vector<2xf32>
    %210 = vector.shape_cast %209 : vector<2xf32> to vector<2x1xf32>
    %211 = vector.broadcast %210 : vector<2x1xf32> to vector<2x8xf32>
    %212 = arith.subf %208, %211 : vector<2x8xf32>
    %213 = math.exp %212 : vector<2x8xf32>
    %cst_34 = arith.constant dense<0.000000e+00> : vector<2xf32>
    %214 = vector.multi_reduction <add>, %213, %cst_34 [1] : vector<2x8xf32> to vector<2xf32>
    %215 = vector.shape_cast %214 : vector<2xf32> to vector<2x1xf32>
    %216 = math.log %215 : vector<2x1xf32>
    %217 = arith.addf %210, %216 : vector<2x1xf32>
    %c0_i32 = arith.constant 0 : i32
    %218 = vector.broadcast %c0_i32 : i32 to vector<2x128xi32>
    %219 = arith.cmpi sge, %206, %218 : vector<2x128xi32>
    %c8_i32 = arith.constant 8 : i32
    %220 = vector.broadcast %c8_i32 : i32 to vector<2x128xi32>
    %221 = arith.cmpi slt, %206, %220 : vector<2x128xi32>
    %222 = arith.andi %219, %221 : vector<2x128xi1>
    %223 = vector.shape_cast %217 : vector<2x1xf32> to vector<2x1xf32>
    %224 = vector.broadcast %223 : vector<2x1xf32> to vector<2x128xf32>
    %225 = arith.select %222, %224, %207 : vector<2x128xi1>, vector<2x128xf32>
    %226 = vector.extract_strided_slice %205 {offsets = [0, 8], sizes = [2, 8], strides = [1, 1]} : vector<2x128xf32> to vector<2x8xf32>
    %cst_35 = arith.constant dense<0xFF800000> : vector<2xf32>
    %227 = vector.multi_reduction <maximumf>, %226, %cst_35 [1] : vector<2x8xf32> to vector<2xf32>
    %228 = vector.shape_cast %227 : vector<2xf32> to vector<2x1xf32>
    %229 = vector.broadcast %228 : vector<2x1xf32> to vector<2x8xf32>
    %230 = arith.subf %226, %229 : vector<2x8xf32>
    %231 = math.exp %230 : vector<2x8xf32>
    %cst_36 = arith.constant dense<0.000000e+00> : vector<2xf32>
    %232 = vector.multi_reduction <add>, %231, %cst_36 [1] : vector<2x8xf32> to vector<2xf32>
    %233 = vector.shape_cast %232 : vector<2xf32> to vector<2x1xf32>
    %234 = math.log %233 : vector<2x1xf32>
    %235 = arith.addf %228, %234 : vector<2x1xf32>
    %c8_i32_37 = arith.constant 8 : i32
    %236 = vector.broadcast %c8_i32_37 : i32 to vector<2x128xi32>
    %237 = arith.cmpi sge, %206, %236 : vector<2x128xi32>
    %c16_i32 = arith.constant 16 : i32
    %238 = vector.broadcast %c16_i32 : i32 to vector<2x128xi32>
    %239 = arith.cmpi slt, %206, %238 : vector<2x128xi32>
    %240 = arith.andi %237, %239 : vector<2x128xi1>
    %241 = vector.shape_cast %235 : vector<2x1xf32> to vector<2x1xf32>
    %242 = vector.broadcast %241 : vector<2x1xf32> to vector<2x128xf32>
    %243 = arith.select %240, %242, %225 : vector<2x128xi1>, vector<2x128xf32>
    %244 = vector.extract_strided_slice %205 {offsets = [0, 16], sizes = [2, 8], strides = [1, 1]} : vector<2x128xf32> to vector<2x8xf32>
    %cst_38 = arith.constant dense<0xFF800000> : vector<2xf32>
    %245 = vector.multi_reduction <maximumf>, %244, %cst_38 [1] : vector<2x8xf32> to vector<2xf32>
    %246 = vector.shape_cast %245 : vector<2xf32> to vector<2x1xf32>
    %247 = vector.broadcast %246 : vector<2x1xf32> to vector<2x8xf32>
    %248 = arith.subf %244, %247 : vector<2x8xf32>
    %249 = math.exp %248 : vector<2x8xf32>
    %cst_39 = arith.constant dense<0.000000e+00> : vector<2xf32>
    %250 = vector.multi_reduction <add>, %249, %cst_39 [1] : vector<2x8xf32> to vector<2xf32>
    %251 = vector.shape_cast %250 : vector<2xf32> to vector<2x1xf32>
    %252 = math.log %251 : vector<2x1xf32>
    %253 = arith.addf %246, %252 : vector<2x1xf32>
    %c16_i32_40 = arith.constant 16 : i32
    %254 = vector.broadcast %c16_i32_40 : i32 to vector<2x128xi32>
    %255 = arith.cmpi sge, %206, %254 : vector<2x128xi32>
    %c24_i32 = arith.constant 24 : i32
    %256 = vector.broadcast %c24_i32 : i32 to vector<2x128xi32>
    %257 = arith.cmpi slt, %206, %256 : vector<2x128xi32>
    %258 = arith.andi %255, %257 : vector<2x128xi1>
    %259 = vector.shape_cast %253 : vector<2x1xf32> to vector<2x1xf32>
    %260 = vector.broadcast %259 : vector<2x1xf32> to vector<2x128xf32>
    %261 = arith.select %258, %260, %243 : vector<2x128xi1>, vector<2x128xf32>
    %262 = vector.extract_strided_slice %205 {offsets = [0, 24], sizes = [2, 8], strides = [1, 1]} : vector<2x128xf32> to vector<2x8xf32>
    %cst_41 = arith.constant dense<0xFF800000> : vector<2xf32>
    %263 = vector.multi_reduction <maximumf>, %262, %cst_41 [1] : vector<2x8xf32> to vector<2xf32>
    %264 = vector.shape_cast %263 : vector<2xf32> to vector<2x1xf32>
    %265 = vector.broadcast %264 : vector<2x1xf32> to vector<2x8xf32>
    %266 = arith.subf %262, %265 : vector<2x8xf32>
    %267 = math.exp %266 : vector<2x8xf32>
    %cst_42 = arith.constant dense<0.000000e+00> : vector<2xf32>
    %268 = vector.multi_reduction <add>, %267, %cst_42 [1] : vector<2x8xf32> to vector<2xf32>
    %269 = vector.shape_cast %268 : vector<2xf32> to vector<2x1xf32>
    %270 = math.log %269 : vector<2x1xf32>
    %271 = arith.addf %264, %270 : vector<2x1xf32>
    %c24_i32_43 = arith.constant 24 : i32
    %272 = vector.broadcast %c24_i32_43 : i32 to vector<2x128xi32>
    %273 = arith.cmpi sge, %206, %272 : vector<2x128xi32>
    %c32_i32 = arith.constant 32 : i32
    %274 = vector.broadcast %c32_i32 : i32 to vector<2x128xi32>
    %275 = arith.cmpi slt, %206, %274 : vector<2x128xi32>
    %276 = arith.andi %273, %275 : vector<2x128xi1>
    %277 = vector.shape_cast %271 : vector<2x1xf32> to vector<2x1xf32>
    %278 = vector.broadcast %277 : vector<2x1xf32> to vector<2x128xf32>
    %279 = arith.select %276, %278, %261 : vector<2x128xi1>, vector<2x128xf32>
    %280 = vector.extract_strided_slice %205 {offsets = [0, 32], sizes = [2, 8], strides = [1, 1]} : vector<2x128xf32> to vector<2x8xf32>
    %cst_44 = arith.constant dense<0xFF800000> : vector<2xf32>
    %281 = vector.multi_reduction <maximumf>, %280, %cst_44 [1] : vector<2x8xf32> to vector<2xf32>
    %282 = vector.shape_cast %281 : vector<2xf32> to vector<2x1xf32>
    %283 = vector.broadcast %282 : vector<2x1xf32> to vector<2x8xf32>
    %284 = arith.subf %280, %283 : vector<2x8xf32>
    %285 = math.exp %284 : vector<2x8xf32>
    %cst_45 = arith.constant dense<0.000000e+00> : vector<2xf32>
    %286 = vector.multi_reduction <add>, %285, %cst_45 [1] : vector<2x8xf32> to vector<2xf32>
    %287 = vector.shape_cast %286 : vector<2xf32> to vector<2x1xf32>
    %288 = math.log %287 : vector<2x1xf32>
    %289 = arith.addf %282, %288 : vector<2x1xf32>
    %c32_i32_46 = arith.constant 32 : i32
    %290 = vector.broadcast %c32_i32_46 : i32 to vector<2x128xi32>
    %291 = arith.cmpi sge, %206, %290 : vector<2x128xi32>
    %c40_i32 = arith.constant 40 : i32
    %292 = vector.broadcast %c40_i32 : i32 to vector<2x128xi32>
    %293 = arith.cmpi slt, %206, %292 : vector<2x128xi32>
    %294 = arith.andi %291, %293 : vector<2x128xi1>
    %295 = vector.shape_cast %289 : vector<2x1xf32> to vector<2x1xf32>
    %296 = vector.broadcast %295 : vector<2x1xf32> to vector<2x128xf32>
    %297 = arith.select %294, %296, %279 : vector<2x128xi1>, vector<2x128xf32>
    %298 = arith.subf %205, %297 : vector<2x128xf32>
    %c0_47 = arith.constant 0 : index
    %c0_48 = arith.constant 0 : index
    %299 = vector.load %arg2[%c0_47, %c0_48] : memref<2x128xf32, #tpu.memory_space<vmem>>, vector<2x128xf32>
    tpu.vector_store %arg2[%c0_47, %c0_48], %298 {strides = array<i32>} : memref<2x128xf32, #tpu.memory_space<vmem>>, vector<2x128xf32>,
    return
  }
}

</mosaic_0001>

<bundles_post_ra>
// kernel: _device_forward.1
= control target key start
LH: loop header
LB: loop body
LE: loop exit
PB: predicated region body
PF: predicated region fallthrough
CT: control target
= control target key end

     0   :  { %7 = vsyncpa [#allocation3], 0  ;;  %s896_s12 = smov [#allocation2]   ;;  %s897_s14 = smov 128   ;;  %s1104_s0 = inlined_call_operand.vmem [shape: s32[16,1], index: 0, kind: input, shape index: {}]   ;;  %s1105_s1 = inlined_call_operand.hbm [shape: f32[200,128], index: 1, kind: input, shape index: {}]   ;;  %s1106_s2 = inlined_call_operand.vmem [shape: f32[2,128], index: 2, kind: output, shape index: {}]  }
   0x1   :  { %s14_s11 = sshll.u32 %s1105_s1, 4  ;;  %s16_s13 = sshll.u32 %s896_s12, 4  ;;  %s15_s11 = int_to_ptr.hbm [resolvable:$true] %s14_s11  ;;  %s17_s13 = int_to_ptr.vmem [resolvable:$true] %s16_s13 }
   0x2   :  { %s898_s15 = smov 8  }
   0x3   :  { %22 = dma.hbm_to_vmem [thread:$0]  %s15_s11, 3200, %s17_s13, [#allocation3], %s897_s14, %s897_s14, %s898_s15  }
   0x4   :  { %894 = dma.done.wait [#allocation3], 3200  }
   0x5   :  { %895 = vsyncadd [#allocation3], 4294964096  ;;  %v899_v0 = vmov 0   ;;  %v54_v1 = vld [vmem:[%s1104_s0] sm:$0xff]  ;;  %v928_v2 = vld [vmem:[#allocation2 + $0x98] sm:$0xff]  ;;  %v900_v11 = vmov 0.0   ;;  %v52_v23 = vlaneseq }
   0x6   :  { %800 = vset.pattern.permute.xlu0 %v899_v0  ;;  %801 = vset.pattern.permute.xlu2 %v899_v0  ;;  %v930_v3 = vld [vmem:[#allocation2 + $0x90] sm:$0xff]  ;;  %v42_v4 = vld [vmem:[#allocation2 + $0x78] sm:$0xff]  ;;  %v933_v5 = vld [vmem:[#allocation2 + $0x88] sm:$0xff]  ;;  %v901_v26 = vmov 1.0   ;;  %s902_s1 = smov 64   ;;  %s903_s18 = smov 96  }
   0x7   :  { %57 = vperm.xlu0 %800, %v54_v1   ;;  %109 = vmatpush.msra.mxu1 %v928_v2  ;;  %v41_v6 = vld [vmem:[#allocation2 + $0x70] sm:$0xff]  ;;  %v40_v7 = vld [vmem:[#allocation2 + $0x68] sm:$0xff]  ;;  %v938_v8 = vld [vmem:[#allocation2 + $0x80] sm:$0xff]  ;;  %v964_v24 = vand.u32 127, %v52_v23  ;;  %vm93_vm5 = vcmask 261120   ;;  %s905_s21 = smov 112  }
   0x8   :  { %69 = vmatpush.msra.mxu0 %v42_v4  ;;  %173 = vmatpush.msra.mxu2 %v928_v2  ;;  %v39_v9 = vld [vmem:[#allocation2 + $0x60] sm:$0xff]  ;;  %v38_v10 = vld [vmem:[#allocation2 + $0x58] sm:$0xff]  ;;  %v37_v12 = vld [vmem:[#allocation2 + $0x50] sm:$0xff]  ;;  %s906_s22 = smov 120  }
   0x9   :  { %110 = vmatpush.msra.mxu1 %v930_v3  ;;  %242 = vmatpush.msra.mxu3 %v928_v2  ;;  %v36_v13 = vld [vmem:[#allocation2 + $0x48] sm:$0xff]  ;;  %v35_v14 = vld [vmem:[#allocation2 + $0x40] sm:$0xff]  ;;  %v34_v15 = vld [vmem:[#allocation2 + $0x38] sm:$0xff] }
   0xa   :  { %70 = vmatpush.msra.mxu0 %v41_v6  ;;  %174 = vmatpush.msra.mxu2 %v930_v3  ;;  %v33_v16 = vld [vmem:[#allocation2 + $0x30] sm:$0xff]  ;;  %v32_v17 = vld [vmem:[#allocation2 + $0x28] sm:$0xff]  ;;  %v31_v18 = vld [vmem:[#allocation2 + $0x20] sm:$0xff] }
   0xb   :  { %111 = vmatpush.msra.mxu1 %v933_v5  ;;  %243 = vmatpush.msra.mxu3 %v930_v3  ;;  %v30_v19 = vld [vmem:[#allocation2 + $0x18] sm:$0xff]  ;;  %v29_v20 = vld [vmem:[#allocation2 + $0x10] sm:$0xff]  ;;  %v28_v21 = vld [vmem:[#allocation2 + $0x8] sm:$0xff] }
   0xc   :  { %71 = vmatpush.msra.mxu0 %v40_v7  ;;  %175 = vmatpush.msra.mxu2 %v933_v5  ;;  %v27_v22 = vld [vmem:[#allocation2] sm:$0xff] }
   0xd   :  { %112 = vmatpush.msra.mxu1 %v938_v8  ;;  %244 = vmatpush.msra.mxu3 %v933_v5  ;;  %v968_v27 = vld [vmem:[#allocation2 + $0xa0] sm:$0xff] }
   0xe   :  { %113 = vmatmul.f32.vlgmr.msra.gmra.mxu1 %v900_v11  ;;  %72 = vmatpush.msra.mxu0 %v39_v9  ;;  %v971_v28 = vperm.slane %v968_v27, 1  ;;  %v68_v31 = vperm.slane %v968_v27, 0 }
   0xf   :  { %176 = vmatpush.msra.mxu2 %v938_v8  ;;  %245 = vmatpush.msra.mxu3 %v938_v8 }
  0x10   :  { %73 = vmatpush.msra.mxu0 %v38_v10  ;;  %311 = vmatpush.msrb.mxu1 %v928_v2 }
  0x11   :  { %380 = vmatpush.msrb.mxu2 %v928_v2  ;;  %445 = vmatpush.msrb.mxu3 %v928_v2 }
  0x12   :  { %74 = vmatpush.msra.mxu0 %v37_v12  ;;  %312 = vmatpush.msrb.mxu1 %v930_v3 }
  0x13   :  { %381 = vmatpush.msrb.mxu2 %v930_v3  ;;  %446 = vmatpush.msrb.mxu3 %v930_v3 }
  0x14   :  { %75 = vmatpush.msra.mxu0 %v36_v13  ;;  %313 = vmatpush.msrb.mxu1 %v933_v5 }
  0x15   :  { %382 = vmatpush.msrb.mxu2 %v933_v5  ;;  %447 = vmatpush.msrb.mxu3 %v933_v5 }
  0x16   :  { %76 = vmatpush.msra.mxu0 %v35_v14  ;;  %314 = vmatpush.msrb.mxu1 %v938_v8 }
  0x17   :  { %383 = vmatpush.msrb.mxu2 %v938_v8  ;;  %448 = vmatpush.msrb.mxu3 %v938_v8 }
  0x18   :  { %77 = vmatpush.msra.mxu0 %v34_v15  ;;  %514 = vmatpush.msra.mxu1 %v928_v2 }
  0x1a   :  { %78 = vmatpush.msra.mxu0 %v33_v16  ;;  %515 = vmatpush.msra.mxu1 %v930_v3 }
  0x1c   :  { %79 = vmatpush.msra.mxu0 %v32_v17  ;;  %516 = vmatpush.msra.mxu1 %v933_v5 }
  0x1e   :  { %80 = vmatpush.msra.mxu0 %v31_v18  ;;  %517 = vmatpush.msra.mxu1 %v938_v8 }
  0x20   :  { %81 = vmatpush.msra.mxu0 %v30_v19 }
  0x22   :  { %82 = vmatpush.msra.mxu0 %v29_v20 }
  0x24   :  { %83 = vmatpush.msra.mxu0 %v28_v21 }
  0x26   :  { %84 = vmatpush.msra.mxu0 %v27_v22 }
  0x79   :  { %v58_v25 = vpop.permute.xlu0 %57 }
  0x7a   :  { %vm62_vm0 = vcmp.eq.s32.totalorder %v58_v25, %v964_v24 }
  0x7b   :  { %771 = vmatmul.msk.f32.vlgmr.msra.gmra.mxu0 %vm62_vm0, %v901_v26 }
  0x8b   :  { %v114_v29 = vpop.f32.mrf.mxu1 }
  0x8c   :  { %v115_v30 = vadd.f32 %v114_v29, %v971_v28 }
  0x8e   :  { %138 = vrot.lane.b32.xlu0 %v115_v30, %s902_s1 }
  0xf8   :  { %v86_v32 = vpop.f32.mrf.mxu0 }
  0xf9   :  { %v978_v33 = vadd.f32 %v86_v32, %v68_v31 }
  0xfb   :  { %v117_v34 = vadd.f32 %v115_v30, %v978_v33 }
  0xfd   :  { %v773_v35 = vmul.f32 -1.442695, %v117_v34 }
  0xff   :  { %802 = vpow2.f32 %v773_v35 }
 0x100   :  { %v139_v45 = vpop.permute.xlu0 %138 }
 0x105   :  { %v803_v36 = vpop.eup %802 }
 0x106   :  { %v121_v37 = vadd.f32 1.0, %v803_v36 }
 0x108   :  { %804 = vrcp.f32 %v121_v37  ;;  %v133_v41 = vand.u32 2147483648, %v121_v37  ;;  %v131_v43 = vand.u32 2147483647, %v121_v37  ;;  %vm127_vm2 = vweird.f32 %v121_v37 }
 0x10a   :  { %v134_v46 = vor.u32 1.1754944e-38, %v133_v41  ;;  %vm132_vm4 = vcmp.eq.f32.partialorder %v131_v43, 8.507059e+37 }
 0x10e   :  { %v805_v38 = vpop.eup %804 }
 0x10f   :  { %v123_v39 = vmul.f32 %v805_v38, %v121_v37  ;;  %vm128_vm1 = vweird.f32 %v805_v38 }
 0x110   :  { %vm129_vm3 = vmor %vm127_vm2, %vm128_vm1 }
 0x111   :  { %v124_v40 = vsub.f32 1.0, %v123_v39 }
 0x113   :  { %v125_v42 = vmul.f32 %v805_v38, %v124_v40 }
 0x115   :  { %v126_v44 = vadd.f32 %v805_v38, %v125_v42 }
 0x117   :  { %v130_v47 = vsel %vm129_vm3, %v805_v38, %v126_v44 }
 0x118   :  { %v135_v48 = vsel %vm132_vm4, %v134_v46, %v130_v47 }
 0x119   :  { %v141_v49 = vmul.f32 %v139_v45, %v135_v48  ;;  %v148_v53 = vsub.f32 1.0, %v135_v48  ;;  %v154_v56 = vmul.f32 0.0, %v135_v48 }
 0x11b   :  { %143 = vrot.lane.b32.xlu1 %v141_v49, %s902_s1 }
 0x18d   :  { %v144_v50 = vpop.permute.xlu1 %143 }
 0x18e   :  { %v146_v51 = vadd.f32 %v144_v50, %v978_v33 }
 0x190   :  { %806 = vtanh.f32 %v146_v51 }
 0x196   :  { %v807_v52 = vpop.eup %806 }
 0x197   :  { %150 = vrot.lane.b32.xlu1 %v807_v52, %s903_s18 }
 0x209   :  { %v151_v54 = vpop.permute.xlu1 %150 }
 0x20a   :  { %v153_v55 = vmul.f32 %v151_v54, %v148_v53 }
 0x20c   :  { %v155_v57 = vadd.f32 %v154_v56, %v153_v55 }
 0x20e   :  { %157 = vrot.lane.b32.xlu2 %v155_v57, %s903_s18  ;;  %v220_v10 = vrot.slane %v155_v57, 6 }
 0x268   :  { %v158_v58 = vpop.permute.xlu2 %157 }
 0x269   :  { %774 = vmatmul.msk.f32.vlgmr.msra.gmra.mxu2 %vm93_vm5, %v158_v58 }
 0x26a   :  { %583 = vmatpush.msra.mxu2 %v928_v2 }
 0x26c   :  { %584 = vmatpush.msra.mxu2 %v930_v3 }
 0x26e   :  { %585 = vmatpush.msra.mxu2 %v933_v5 }
 0x270   :  { %586 = vmatpush.msra.mxu2 %v938_v8 }
 0x2ec   :  { %v178_v59 = vpop.f32.mrf.mxu2 }
 0x2ed   :  { %v179_v60 = vadd.f32 %v178_v59, %v971_v28 }
 0x2ef   :  { %v182_v61 = vrot.slane %v179_v60, 6 }
 0x2f1   :  { %v184_v62 = vadd.f32 %v182_v61, %v978_v33  ;;  %204 = vrot.lane.b32.xlu2 %v182_v61, %s902_s1 }
 0x2f3   :  { %v775_v63 = vmul.f32 -1.442695, %v184_v62 }
 0x2f5   :  { %808 = vpow2.f32 %v775_v63 }
 0x2fb   :  { %v809_v0 = vpop.eup %808 }
 0x2fc   :  { %v188_v1 = vadd.f32 1.0, %v809_v0 }
 0x2fe   :  { %810 = vrcp.f32 %v188_v1  ;;  %v200_v6 = vand.u32 2147483648, %v188_v1  ;;  %v198_v7 = vand.u32 2147483647, %v188_v1  ;;  %vm194_vm7 = vweird.f32 %v188_v1 }
 0x300   :  { %v201_v9 = vor.u32 1.1754944e-38, %v200_v6  ;;  %vm199_vm9 = vcmp.eq.f32.partialorder %v198_v7, 8.507059e+37 }
 0x304   :  { %v811_v2 = vpop.eup %810 }
 0x305   :  { %v190_v4 = vmul.f32 %v811_v2, %v188_v1  ;;  %vm195_vm6 = vweird.f32 %v811_v2 }
 0x306   :  { %vm196_vm8 = vmor %vm194_vm7, %vm195_vm6 }
 0x307   :  { %v191_v3 = vsub.f32 1.0, %v190_v4 }
 0x309   :  { %v192_v5 = vmul.f32 %v811_v2, %v191_v3 }
 0x30b   :  { %v193_v8 = vadd.f32 %v811_v2, %v192_v5 }
 0x30d   :  { %v197_v11 = vsel %vm196_vm8, %v811_v2, %v193_v8 }
 0x30e   :  { %v202_v12 = vsel %vm199_vm9, %v201_v9, %v197_v11 }
 0x30f   :  { %v222_v13 = vmul.f32 %v220_v10, %v202_v12  ;;  %v214_v19 = vsub.f32 1.0, %v202_v12 }
 0x34b   :  { %v205_v14 = vpop.permute.xlu2 %204 }
 0x34c   :  { %v207_v15 = vmul.f32 %v205_v14, %v202_v12 }
 0x34e   :  { %209 = vrot.lane.b32.xlu0 %v207_v15, %s902_s1 }
 0x3c0   :  { %v210_v16 = vpop.permute.xlu0 %209 }
 0x3c1   :  { %v212_v17 = vadd.f32 %v210_v16, %v978_v33 }
 0x3c3   :  { %812 = vtanh.f32 %v212_v17 }
 0x3c9   :  { %v813_v18 = vpop.eup %812 }
 0x3ca   :  { %216 = vrot.lane.b32.xlu1 %v813_v18, %s903_s18 }
 0x43c   :  { %v217_v20 = vpop.permute.xlu1 %216 }
 0x43d   :  { %v219_v21 = vmul.f32 %v217_v20, %v214_v19  ;;  %v55_v19 = vld [vmem:[%s1104_s0 + $0x8] sm:$0xff]  ;;  %s904_s0 = smov 104  }
 0x43f   :  { %v223_v22 = vadd.f32 %v222_v13, %v219_v21 }
 0x441   :  { %v225_v23 = vrot.slane %v223_v22, 2  ;;  %v289_v53 = vrot.slane %v223_v22, 6 }
 0x443   :  { %226 = vrot.lane.b32.xlu2 %v225_v23, %s903_s18 }
 0x49d   :  { %v227_v25 = vpop.permute.xlu2 %226 }
 0x49e   :  { %776 = vmatmul.msk.f32.vlgmr.msra.gmra.mxu3 %vm93_vm5, %v227_v25 }
 0x521   :  { %v247_v29 = vpop.f32.mrf.mxu3 }
 0x522   :  { %v248_v30 = vadd.f32 %v247_v29, %v971_v28 }
 0x524   :  { %v251_v32 = vrot.slane %v248_v30, 4 }
 0x526   :  { %273 = vrot.lane.b32.xlu0 %v251_v32, %s902_s1  ;;  %v253_v34 = vadd.f32 %v251_v32, %v978_v33 }
 0x528   :  { %v777_v35 = vmul.f32 -1.442695, %v253_v34 }
 0x52a   :  { %814 = vpow2.f32 %v777_v35 }
 0x530   :  { %v815_v36 = vpop.eup %814 }
 0x531   :  { %v257_v37 = vadd.f32 1.0, %v815_v36 }
 0x533   :  { %816 = vrcp.f32 %v257_v37  ;;  %v269_v43 = vand.u32 2147483648, %v257_v37  ;;  %vm263_vm11 = vweird.f32 %v257_v37  ;;  %v267_v44 = vand.u32 2147483647, %v257_v37 }
 0x535   :  { %v270_v46 = vor.u32 1.1754944e-38, %v269_v43  ;;  %vm268_vm13 = vcmp.eq.f32.partialorder %v267_v44, 8.507059e+37 }
 0x539   :  { %v817_v38 = vpop.eup %816 }
 0x53a   :  { %v259_v39 = vmul.f32 %v817_v38, %v257_v37  ;;  %vm264_vm10 = vweird.f32 %v817_v38 }
 0x53b   :  { %vm265_vm12 = vmor %vm263_vm11, %vm264_vm10 }
 0x53c   :  { %v260_v40 = vsub.f32 1.0, %v259_v39 }
 0x53e   :  { %v261_v41 = vmul.f32 %v817_v38, %v260_v40 }
 0x540   :  { %v262_v42 = vadd.f32 %v817_v38, %v261_v41 }
 0x542   :  { %v266_v45 = vsel %vm265_vm12, %v817_v38, %v262_v42 }
 0x543   :  { %v271_v48 = vsel %vm268_vm13, %v270_v46, %v266_v45 }
 0x544   :  { %v283_v54 = vsub.f32 1.0, %v271_v48  ;;  %v291_v56 = vmul.f32 %v289_v53, %v271_v48 }
 0x598   :  { %v274_v47 = vpop.permute.xlu0 %273 }
 0x599   :  { %v276_v49 = vmul.f32 %v274_v47, %v271_v48 }
 0x59b   :  { %278 = vrot.lane.b32.xlu1 %v276_v49, %s902_s1 }
 0x60d   :  { %v279_v50 = vpop.permute.xlu1 %278 }
 0x60e   :  { %v281_v51 = vadd.f32 %v279_v50, %v978_v33 }
 0x610   :  { %818 = vtanh.f32 %v281_v51 }
 0x616   :  { %v819_v52 = vpop.eup %818 }
 0x617   :  { %285 = vrot.lane.b32.xlu2 %v819_v52, %s903_s18 }
 0x671   :  { %v286_v55 = vpop.permute.xlu2 %285 }
 0x672   :  { %v288_v57 = vmul.f32 %v286_v55, %v283_v54 }
 0x674   :  { %v292_v58 = vadd.f32 %v291_v56, %v288_v57 }
 0x676   :  { %v294_v59 = vrot.slane %v292_v58, 4  ;;  %v358_v20 = vrot.slane %v292_v58, 6 }
 0x678   :  { %295 = vrot.lane.b32.xlu0 %v294_v59, %s903_s18 }
 0x6ea   :  { %v296_v60 = vpop.permute.xlu0 %295 }
 0x6eb   :  { %778 = vmatmul.msk.f32.vlgmr.msrb.gmra.mxu1 %vm93_vm5, %v296_v60 }
 0x768   :  { %v316_v61 = vpop.f32.mrf.mxu1 }
 0x769   :  { %v317_v62 = vadd.f32 %v316_v61, %v971_v28 }
 0x76b   :  { %v320_v63 = vrot.slane %v317_v62, 2 }
 0x76d   :  { %342 = vrot.lane.b32.xlu1 %v320_v63, %s902_s1  ;;  %v322_v0 = vadd.f32 %v320_v63, %v978_v33 }
 0x76f   :  { %v779_v1 = vmul.f32 -1.442695, %v322_v0 }
 0x771   :  { %820 = vpow2.f32 %v779_v1 }
 0x777   :  { %v821_v2 = vpop.eup %820 }
 0x778   :  { %v326_v4 = vadd.f32 1.0, %v821_v2 }
 0x77a   :  { %822 = vrcp.f32 %v326_v4  ;;  %v338_v9 = vand.u32 2147483648, %v326_v4  ;;  %vm332_vm15 = vweird.f32 %v326_v4  ;;  %v336_v10 = vand.u32 2147483647, %v326_v4 }
 0x77c   :  { %v339_v12 = vor.u32 1.1754944e-38, %v338_v9  ;;  %vm337_vm1 = vcmp.eq.f32.partialorder %v336_v10, 8.507059e+37 }
 0x780   :  { %v823_v3 = vpop.eup %822 }
 0x781   :  { %v328_v6 = vmul.f32 %v823_v3, %v326_v4  ;;  %vm333_vm14 = vweird.f32 %v823_v3 }
 0x782   :  { %vm334_vm0 = vmor %vm332_vm15, %vm333_vm14 }
 0x783   :  { %v329_v5 = vsub.f32 1.0, %v328_v6 }
 0x785   :  { %v330_v7 = vmul.f32 %v823_v3, %v329_v5 }
 0x787   :  { %v331_v8 = vadd.f32 %v823_v3, %v330_v7 }
 0x789   :  { %v335_v11 = vsel %vm334_vm0, %v823_v3, %v331_v8 }
 0x78a   :  { %v340_v14 = vsel %vm337_vm1, %v339_v12, %v335_v11 }
 0x78b   :  { %v352_v21 = vsub.f32 1.0, %v340_v14  ;;  %v360_v23 = vmul.f32 %v358_v20, %v340_v14 }
 0x7df   :  { %v343_v13 = vpop.permute.xlu1 %342 }
 0x7e0   :  { %v345_v15 = vmul.f32 %v343_v13, %v340_v14 }
 0x7e2   :  { %347 = vrot.lane.b32.xlu2 %v345_v15, %s902_s1 }
 0x7ea   :  { %60 = vperm.xlu2 %801, %v55_v19  }
 0x83c   :  { %v348_v16 = vpop.permute.xlu2 %347 }
 0x83d   :  { %v350_v17 = vadd.f32 %v348_v16, %v978_v33 }
 0x83f   :  { %824 = vtanh.f32 %v350_v17 }
 0x844   :  { %v61_v32 = vpop.permute.xlu2 %60 }
 0x845   :  { %v825_v18 = vpop.eup %824  ;;  %vm63_vm2 = vcmp.eq.s32.totalorder %v61_v32, %v964_v24 }
 0x846   :  { %354 = vrot.lane.b32.xlu0 %v825_v18, %s903_s18  ;;  %772 = vmatmul.msk.f32.gmra.mxu0 %vm63_vm2, %v901_v26 }
 0x8b8   :  { %v355_v22 = vpop.permute.xlu0 %354 }
 0x8b9   :  { %v357_v25 = vmul.f32 %v355_v22, %v352_v21 }
 0x8bb   :  { %v361_v29 = vadd.f32 %v360_v23, %v357_v25 }
 0x8bd   :  { %v363_v30 = vrot.slane %v361_v29, 6 }
 0x8bf   :  { %364 = vrot.lane.b32.xlu1 %v363_v30, %s903_s18 }
 0x8c3   :  { %v89_v36 = vpop.f32.mrf.mxu0 }
 0x8c4   :  { %v1023_v37 = vadd.f32 %v89_v36, %v68_v31 }
 0x931   :  { %v365_v33 = vpop.permute.xlu1 %364 }
 0x932   :  { %780 = vmatmul.msk.f32.vlgmr.msrb.gmra.mxu2 %vm93_vm5, %v365_v33 }
 0x9b5   :  { %v385_v34 = vpop.f32.mrf.mxu2 }
 0x9b6   :  { %v386_v35 = vadd.f32 %v385_v34, %v971_v28 }
 0x9b8   :  { %409 = vrot.lane.b32.xlu0 %v386_v35, %s902_s1  ;;  %v388_v38 = vadd.f32 %v386_v35, %v1023_v37 }
 0x9ba   :  { %v781_v39 = vmul.f32 -1.442695, %v388_v38 }
 0x9bc   :  { %826 = vpow2.f32 %v781_v39 }
 0x9c2   :  { %v827_v40 = vpop.eup %826 }
 0x9c3   :  { %v392_v41 = vadd.f32 1.0, %v827_v40 }
 0x9c5   :  { %828 = vrcp.f32 %v392_v41  ;;  %v404_v46 = vand.u32 2147483648, %v392_v41  ;;  %vm398_vm4 = vweird.f32 %v392_v41  ;;  %v402_v47 = vand.u32 2147483647, %v392_v41 }
 0x9c7   :  { %v405_v31 = vor.u32 1.1754944e-38, %v404_v46  ;;  %vm403_vm7 = vcmp.eq.f32.partialorder %v402_v47, 8.507059e+37 }
 0x9cb   :  { %v829_v26 = vpop.eup %828 }
 0x9cc   :  { %v394_v42 = vmul.f32 %v829_v26, %v392_v41  ;;  %vm399_vm3 = vweird.f32 %v829_v26 }
 0x9cd   :  { %vm400_vm6 = vmor %vm398_vm4, %vm399_vm3  ;;  %vm720_vm4 = vcmask 255168  }
 0x9ce   :  { %v395_v43 = vsub.f32 1.0, %v394_v42 }
 0x9d0   :  { %v396_v44 = vmul.f32 %v829_v26, %v395_v43 }
 0x9d2   :  { %v397_v45 = vadd.f32 %v829_v26, %v396_v44 }
 0x9d4   :  { %v401_v48 = vsel %vm400_vm6, %v829_v26, %v397_v45  ;;  %vm699_vm6 = vcmask 189568  }
 0x9d5   :  { %v406_v50 = vsel %vm403_vm7, %v405_v31, %v401_v48  ;;  %vm678_vm7 = vcmask 123968  }
 0x9d6   :  { %v419_v55 = vsub.f32 1.0, %v406_v50  ;;  %v426_v57 = vmul.f32 %v406_v50, %v363_v30 }
 0xa2a   :  { %v410_v49 = vpop.permute.xlu0 %409 }
 0xa2b   :  { %v412_v51 = vmul.f32 %v410_v49, %v406_v50 }
 0xa2d   :  { %414 = vrot.lane.b32.xlu1 %v412_v51, %s902_s1 }
 0xa9f   :  { %v415_v52 = vpop.permute.xlu1 %414 }
 0xaa0   :  { %v417_v53 = vadd.f32 %v415_v52, %v1023_v37 }
 0xaa2   :  { %830 = vtanh.f32 %v417_v53 }
 0xaa8   :  { %v831_v54 = vpop.eup %830 }
 0xaa9   :  { %421 = vrot.lane.b32.xlu2 %v831_v54, %s903_s18 }
 0xb03   :  { %v422_v56 = vpop.permute.xlu2 %421 }
 0xb04   :  { %v424_v58 = vmul.f32 %v422_v56, %v419_v55 }
 0xb06   :  { %v427_v59 = vadd.f32 %v426_v57, %v424_v58 }
 0xb08   :  { %429 = vrot.lane.b32.xlu0 %v427_v59, %s903_s18  ;;  %v492_v19 = vrot.slane %v427_v59, 6 }
 0xb7a   :  { %v430_v60 = vpop.permute.xlu0 %429 }
 0xb7b   :  { %782 = vmatmul.msk.f32.vlgmr.msrb.gmra.mxu3 %vm93_vm5, %v430_v60 }
 0xbfe   :  { %v450_v61 = vpop.f32.mrf.mxu3 }
 0xbff   :  { %v451_v62 = vadd.f32 %v450_v61, %v971_v28 }
 0xc01   :  { %v454_v63 = vrot.slane %v451_v62, 6 }
 0xc03   :  { %476 = vrot.lane.b32.xlu1 %v454_v63, %s902_s1  ;;  %v456_v0 = vadd.f32 %v454_v63, %v1023_v37 }
 0xc05   :  { %v783_v1 = vmul.f32 -1.442695, %v456_v0 }
 0xc07   :  { %832 = vpow2.f32 %v783_v1 }
 0xc0d   :  { %v833_v2 = vpop.eup %832 }
 0xc0e   :  { %v460_v4 = vadd.f32 1.0, %v833_v2 }
 0xc10   :  { %834 = vrcp.f32 %v460_v4  ;;  %v472_v9 = vand.u32 2147483648, %v460_v4  ;;  %vm466_vm9 = vweird.f32 %v460_v4  ;;  %v470_v10 = vand.u32 2147483647, %v460_v4 }
 0xc12   :  { %v473_v12 = vor.u32 1.1754944e-38, %v472_v9  ;;  %vm471_vm11 = vcmp.eq.f32.partialorder %v470_v10, 8.507059e+37 }
 0xc16   :  { %v835_v3 = vpop.eup %834 }
 0xc17   :  { %v462_v6 = vmul.f32 %v835_v3, %v460_v4  ;;  %vm467_vm8 = vweird.f32 %v835_v3 }
 0xc18   :  { %vm468_vm10 = vmor %vm466_vm9, %vm467_vm8  ;;  %vm741_vm8 = vcmask 320768   ;;  %vm661_vm9 = vcmask 58368  }
 0xc19   :  { %v463_v5 = vsub.f32 1.0, %v462_v6 }
 0xc1b   :  { %v464_v7 = vmul.f32 %v835_v3, %v463_v5 }
 0xc1d   :  { %v465_v8 = vadd.f32 %v835_v3, %v464_v7 }
 0xc1f   :  { %v469_v11 = vsel %vm468_vm10, %v835_v3, %v465_v8  ;;  %vm696_vm10 = vcmp.lt.s32.totalorder %v964_v24, 16 }
 0xc20   :  { %v474_v14 = vsel %vm471_vm11, %v473_v12, %v469_v11  ;;  %vm716_vm11 = vcmp.ge.s32.totalorder %v964_v24, 16 }
 0xc21   :  { %v486_v20 = vsub.f32 1.0, %v474_v14  ;;  %v494_v23 = vmul.f32 %v492_v19, %v474_v14  ;;  %v50_v19 = vld [vmem:[#allocation2 + $0xb8] sm:$0xff] }
 0xc75   :  { %v477_v13 = vpop.permute.xlu1 %476 }
 0xc76   :  { %v479_v15 = vmul.f32 %v477_v13, %v474_v14 }
 0xc78   :  { %481 = vrot.lane.b32.xlu2 %v479_v15, %s902_s1 }
 0xcd2   :  { %v482_v16 = vpop.permute.xlu2 %481 }
 0xcd3   :  { %v484_v17 = vadd.f32 %v482_v16, %v1023_v37 }
 0xcd5   :  { %836 = vtanh.f32 %v484_v17 }
 0xcdb   :  { %v837_v18 = vpop.eup %836 }
 0xcdc   :  { %488 = vrot.lane.b32.xlu0 %v837_v18, %s903_s18  ;;  %v51_v18 = vld [vmem:[#allocation2 + $0xc0] sm:$0xff] }
 0xcdd   :  { %653 = vmatpush.msra.mxu3 %v51_v18 }
 0xcdf   :  { %654 = vmatpush.msra.mxu3 %v50_v19 }
 0xd4e   :  { %v489_v21 = vpop.permute.xlu0 %488 }
 0xd4f   :  { %v491_v22 = vmul.f32 %v489_v21, %v486_v20  ;;  %v49_v20 = vld [vmem:[#allocation2 + $0xb0] sm:$0xff]  ;;  %v48_v21 = vld [vmem:[#allocation2 + $0xa8] sm:$0xff] }
 0xd50   :  { %655 = vmatpush.msra.mxu3 %v49_v20 }
 0xd51   :  { %v495_v25 = vadd.f32 %v494_v23, %v491_v22 }
 0xd52   :  { %656 = vmatpush.msra.mxu3 %v48_v21 }
 0xd53   :  { %v497_v29 = vrot.slane %v495_v25, 2  ;;  %v561_v47 = vrot.slane %v495_v25, 6 }
 0xd55   :  { %498 = vrot.lane.b32.xlu1 %v497_v29, %s903_s18 }
 0xdc7   :  { %v499_v30 = vpop.permute.xlu1 %498 }
 0xdc8   :  { %784 = vmatmul.msk.f32.vlgmr.msra.gmra.mxu1 %vm93_vm5, %v499_v30 }
 0xe45   :  { %v519_v32 = vpop.f32.mrf.mxu1 }
 0xe46   :  { %v520_v33 = vadd.f32 %v519_v32, %v971_v28 }
 0xe48   :  { %v523_v34 = vrot.slane %v520_v33, 4 }
 0xe4a   :  { %v525_v35 = vadd.f32 %v523_v34, %v1023_v37  ;;  %545 = vrot.lane.b32.xlu2 %v523_v34, %s902_s1  ;;  %v634_v34 = vperm.slane %v968_v27, 2 }
 0xe4c   :  { %v785_v36 = vmul.f32 -1.442695, %v525_v35 }
 0xe4e   :  { %838 = vpow2.f32 %v785_v36 }
 0xe54   :  { %v839_v38 = vpop.eup %838 }
 0xe55   :  { %v529_v39 = vadd.f32 1.0, %v839_v38 }
 0xe57   :  { %840 = vrcp.f32 %v529_v39  ;;  %v541_v42 = vand.u32 2147483648, %v529_v39  ;;  %v539_v44 = vand.u32 2147483647, %v529_v39  ;;  %vm535_vm13 = vweird.f32 %v529_v39 }
 0xe59   :  { %v542_v46 = vor.u32 1.1754944e-38, %v541_v42  ;;  %vm540_vm15 = vcmp.eq.f32.partialorder %v539_v44, 8.507059e+37 }
 0xe5d   :  { %v841_v40 = vpop.eup %840 }
 0xe5e   :  { %v531_v41 = vmul.f32 %v841_v40, %v529_v39  ;;  %vm536_vm12 = vweird.f32 %v841_v40 }
 0xe5f   :  { %vm537_vm14 = vmor %vm535_vm13, %vm536_vm12  ;;  %vm717_vm12 = vcmp.lt.s32.totalorder %v964_v24, 24  ;;  %vm675_vm13 = vcmp.lt.s32.totalorder %v964_v24, 8 }
 0xe60   :  { %v532_v26 = vsub.f32 1.0, %v531_v41 }
 0xe62   :  { %v533_v43 = vmul.f32 %v841_v40, %v532_v26 }
 0xe64   :  { %v534_v45 = vadd.f32 %v841_v40, %v533_v43 }
 0xe66   :  { %v538_v48 = vsel %vm537_vm14, %v841_v40, %v534_v45 }
 0xe67   :  { %v543_v31 = vsel %vm540_vm15, %v542_v46, %v538_v48  ;;  %vm718_vm15 = vmand %vm716_vm11, %vm717_vm12 }
 0xe68   :  { %v563_v49 = vmul.f32 %v561_v47, %v543_v31  ;;  %v555_v55 = vsub.f32 1.0, %v543_v31 }
 0xea4   :  { %v546_v50 = vpop.permute.xlu2 %545 }
 0xea5   :  { %v548_v51 = vmul.f32 %v546_v50, %v543_v31 }
 0xea7   :  { %550 = vrot.lane.b32.xlu0 %v548_v51, %s902_s1 }
 0xf19   :  { %v551_v52 = vpop.permute.xlu0 %550 }
 0xf1a   :  { %v553_v53 = vadd.f32 %v551_v52, %v1023_v37 }
 0xf1c   :  { %842 = vtanh.f32 %v553_v53 }
 0xf22   :  { %v843_v54 = vpop.eup %842 }
 0xf23   :  { %557 = vrot.lane.b32.xlu1 %v843_v54, %s903_s18 }
 0xf95   :  { %v558_v56 = vpop.permute.xlu1 %557 }
 0xf96   :  { %v560_v57 = vmul.f32 %v558_v56, %v555_v55 }
 0xf98   :  { %v564_v58 = vadd.f32 %v563_v49, %v560_v57 }
 0xf9a   :  { %v566_v59 = vrot.slane %v564_v58, 4  ;;  %v630_v22 = vrot.slane %v564_v58, 6 }
 0xf9c   :  { %567 = vrot.lane.b32.xlu2 %v566_v59, %s903_s18 }
 0xff6   :  { %v568_v60 = vpop.permute.xlu2 %567 }
 0xff7   :  { %786 = vmatmul.msk.f32.vlgmr.msra.gmra.mxu2 %vm93_vm5, %v568_v60 }
0x107a   :  { %v588_v61 = vpop.f32.mrf.mxu2 }
0x107b   :  { %v589_v62 = vadd.f32 %v588_v61, %v971_v28 }
0x107d   :  { %v592_v63 = vrot.slane %v589_v62, 2 }
0x107f   :  { %614 = vrot.lane.b32.xlu0 %v592_v63, %s902_s1  ;;  %v594_v0 = vadd.f32 %v592_v63, %v1023_v37 }
0x1081   :  { %v787_v1 = vmul.f32 -1.442695, %v594_v0 }
0x1083   :  { %844 = vpow2.f32 %v787_v1 }
0x1089   :  { %v845_v2 = vpop.eup %844 }
0x108a   :  { %v598_v4 = vadd.f32 1.0, %v845_v2 }
0x108c   :  { %846 = vrcp.f32 %v598_v4  ;;  %v610_v9 = vand.u32 2147483648, %v598_v4  ;;  %vm604_vm1 = vweird.f32 %v598_v4  ;;  %v608_v10 = vand.u32 2147483647, %v598_v4 }
0x108e   :  { %v611_v11 = vor.u32 1.1754944e-38, %v610_v9  ;;  %vm609_vm3 = vcmp.eq.f32.partialorder %v608_v10, 8.507059e+37 }
0x1092   :  { %v847_v3 = vpop.eup %846 }
0x1093   :  { %v600_v6 = vmul.f32 %v847_v3, %v598_v4  ;;  %vm605_vm0 = vweird.f32 %v847_v3 }
0x1094   :  { %vm606_vm2 = vmor %vm604_vm1, %vm605_vm0  ;;  %vm737_vm0 = vcmp.ge.s32.totalorder %v964_v24, 24  ;;  %vm738_vm1 = vcmp.lt.s32.totalorder %v964_v24, 32 }
0x1095   :  { %v601_v5 = vsub.f32 1.0, %v600_v6 }
0x1097   :  { %v602_v7 = vmul.f32 %v847_v3, %v601_v5 }
0x1099   :  { %v603_v8 = vadd.f32 %v847_v3, %v602_v7 }
0x109b   :  { %v607_v28 = vsel %vm606_vm2, %v847_v3, %v603_v8  ;;  %vm758_vm2 = vcmp.ge.s32.totalorder %v964_v24, 32 }
0x109c   :  { %v612_v13 = vsel %vm609_vm3, %v611_v11, %v607_v28  ;;  %vm759_vm3 = vcmp.lt.s32.totalorder %v964_v24, 40 }
0x109d   :  { %v624_v23 = vsub.f32 1.0, %v612_v13  ;;  %v632_v29 = vmul.f32 %v630_v22, %v612_v13 }
0x10f1   :  { %v615_v12 = vpop.permute.xlu0 %614 }
0x10f2   :  { %v617_v14 = vmul.f32 %v615_v12, %v612_v13 }
0x10f4   :  { %619 = vrot.lane.b32.xlu1 %v617_v14, %s902_s1 }
0x1166   :  { %v620_v15 = vpop.permute.xlu1 %619 }
0x1167   :  { %v622_v16 = vadd.f32 %v620_v15, %v1023_v37 }
0x1169   :  { %848 = vtanh.f32 %v622_v16 }
0x116f   :  { %v849_v17 = vpop.eup %848 }
0x1170   :  { %626 = vrot.lane.b32.xlu2 %v849_v17, %s903_s18 }
0x11ca   :  { %v627_v25 = vpop.permute.xlu2 %626 }
0x11cb   :  { %v629_v30 = vmul.f32 %v627_v25, %v624_v23 }
0x11cd   :  { %v633_v32 = vadd.f32 %v632_v29, %v629_v30 }
0x11cf   :  { %v636_v33 = vrot.slane %v633_v32, 6 }
0x11d1   :  { %637 = vrot.lane.b32.xlu0 %v636_v33, %s903_s18 }
0x1243   :  { %v638_v37 = vpop.permute.xlu0 %637 }
0x1244   :  { %788 = vmatmul.msk.f32.vlgmr.msra.gmra.mxu3 %vm93_vm5, %v638_v37  ;;  %vm695_vm5 = vcmp.ge.s32.totalorder %v964_v24, 8 }
0x1245   :  { %vm697_vm14 = vmand %vm695_vm5, %vm696_vm10 }
0x12c7   :  { %v658_v35 = vpop.f32.mrf.mxu3 }
0x12c8   :  { %v1056_v36 = vadd.f32 %v658_v35, %v634_v34 }
0x12ca   :  { %v721_v38 = vsel %vm720_vm4, %v1056_v36, -inf  ;;  %v700_v39 = vsel %vm699_vm6, %v1056_v36, -inf  ;;  %v679_v40 = vsel %vm678_vm7, %v1056_v36, -inf  ;;  %v742_v41 = vsel %vm741_vm8, %v1056_v36, -inf  ;;  %vm739_vm4 = vmand %vm737_vm0, %vm738_vm1 }
0x12cb   :  { %722 = vmax.xlane.f32.xlu0 %v721_v38  ;;  %701 = vmax.xlane.f32.xlu2 %v700_v39  ;;  %v662_v27 = vsel %vm661_vm9, %v1056_v36, -inf  ;;  %vm760_vm6 = vmand %vm758_vm2, %vm759_vm3 }
0x12cc   :  { %680 = vmax.xlane.f32.xlu1 %v679_v40 }
0x12d3   :  { %743 = vmax.xlane.f32.xlu2 %v742_v41 }
0x12d4   :  { %663 = vmax.xlane.f32.xlu1 %v662_v27 }
0x133e   :  { %v1064_v26 = vpop.xlane.xlu0 %722  ;;  %v1066_v42 = vpop.xlane.xlu2 %701 }
0x133f   :  { %v724_v43 = vsub.f32 %v1056_v36, %v1064_v26  ;;  %v703_v44 = vsub.f32 %v1056_v36, %v1066_v42  ;;  %v1072_v45 = vpop.xlane.xlu1 %680 }
0x1340   :  { %v682_v46 = vsub.f32 %v1056_v36, %v1072_v45 }
0x1341   :  { %v725_v47 = vmul.f32 1.442695, %v724_v43  ;;  %v704_v48 = vmul.f32 1.442695, %v703_v44 }
0x1342   :  { %v683_v31 = vmul.f32 1.442695, %v682_v46 }
0x1343   :  { %850 = vpow2.f32 %v725_v47 }
0x1344   :  { %852 = vpow2.f32 %v704_v48 }
0x1345   :  { %854 = vpow2.f32 %v683_v31 }
0x1346   :  { %v1076_v49 = vpop.xlane.xlu2 %743 }
0x1347   :  { %v745_v50 = vsub.f32 %v1056_v36, %v1076_v49  ;;  %v664_v56 = vpop.xlane.xlu1 %663 }
0x1348   :  { %v665_v57 = vsub.f32 %v1056_v36, %v664_v56 }
0x1349   :  { %v851_v51 = vpop.eup %850  ;;  %v746_v52 = vmul.f32 1.442695, %v745_v50 }
0x134a   :  { %v853_v53 = vpop.eup %852  ;;  %728 = vrot.lane.b32.xlu1 %v851_v51, %s904_s0  ;;  %v666_v58 = vmul.f32 1.442695, %v665_v57 }
0x134b   :  { %v855_v54 = vpop.eup %854  ;;  %856 = vpow2.f32 %v746_v52  ;;  %707 = vrot.lane.b32.xlu0 %v853_v53, %s905_s21 }
0x134c   :  { %686 = vrot.lane.b32.xlu2 %v855_v54, %s906_s22  ;;  %858 = vpow2.f32 %v666_v58 }
0x1351   :  { %v857_v55 = vpop.eup %856 }
0x1352   :  { %v859_v59 = vpop.eup %858 }
0x1353   :  { %749 = vrot.lane.b32.xlu0 %v857_v55, %s903_s18  ;;  %v668_v60 = vsel %vm661_vm9, %v859_v59, 0.0 }
0x1375   :  { %669 = vadd.xlane.f32.xlu2 %v668_v60 }
0x13a6   :  { %v687_v61 = vpop.permute.xlu2 %686 }
0x13a7   :  { %v689_v62 = vsel %vm661_vm9, %v687_v61, 0.0 }
0x13a8   :  { %690 = vadd.xlane.f32.xlu1 %v689_v62 }
0x13bc   :  { %v729_v63 = vpop.permute.xlu1 %728 }
0x13bd   :  { %v708_v0 = vpop.permute.xlu0 %707  ;;  %v731_v1 = vsel %vm661_vm9, %v729_v63, 0.0 }
0x13be   :  { %v710_v2 = vsel %vm661_vm9, %v708_v0, 0.0  ;;  %732 = vadd.xlane.f32.xlu2 %v731_v1 }
0x13bf   :  { %711 = vadd.xlane.f32.xlu0 %v710_v2 }
0x13c5   :  { %v750_v4 = vpop.permute.xlu0 %749 }
0x13c6   :  { %v752_v3 = vsel %vm661_vm9, %v750_v4, 0.0 }
0x13c7   :  { %753 = vadd.xlane.f32.xlu1 %v752_v3 }
0x13e8   :  { %v670_v6 = vpop.xlane.xlu2 %669 }
0x13e9   :  { %860 = vlog2.f32 %v670_v6 }
0x13ef   :  { %v861_v9 = vpop.eup %860 }
0x13f0   :  { %v672_v28 = vmul.f32 0.6931472, %v861_v9 }
0x13f2   :  { %v673_v16 = vadd.f32 %v672_v28, %v664_v56 }
0x13f4   :  { %v677_v20 = vsel %vm675_vm13, %v673_v16, 0.0 }
0x141b   :  { %v691_v5 = vpop.xlane.xlu1 %690 }
0x141c   :  { %862 = vlog2.f32 %v691_v5 }
0x1422   :  { %v863_v10 = vpop.eup %862 }
0x1423   :  { %v693_v12 = vmul.f32 0.6931472, %v863_v10 }
0x1425   :  { %v694_v17 = vadd.f32 %v693_v12, %v1072_v45 }
0x1427   :  { %v698_v22 = vsel %vm697_vm14, %v694_v17, %v677_v20 }
0x1431   :  { %v733_v7 = vpop.xlane.xlu2 %732 }
0x1432   :  { %v712_v8 = vpop.xlane.xlu0 %711 }
0x1433   :  { %864 = vlog2.f32 %v712_v8 }
0x1434   :  { %866 = vlog2.f32 %v733_v7 }
0x1439   :  { %v865_v11 = vpop.eup %864 }
0x143a   :  { %v867_v13 = vpop.eup %866  ;;  %v714_v14 = vmul.f32 0.6931472, %v865_v11  ;;  %v754_v15 = vpop.xlane.xlu1 %753 }
0x143b   :  { %868 = vlog2.f32 %v754_v15  ;;  %v735_v18 = vmul.f32 0.6931472, %v867_v13 }
0x143c   :  { %v715_v19 = vadd.f32 %v714_v14, %v1066_v42 }
0x143d   :  { %v736_v23 = vadd.f32 %v735_v18, %v1064_v26 }
0x143e   :  { %v719_v25 = vsel %vm718_vm15, %v715_v19, %v698_v22 }
0x143f   :  { %v740_v32 = vsel %vm739_vm4, %v736_v23, %v719_v25 }
0x1441   :  { %v869_v21 = vpop.eup %868 }
0x1442   :  { %v756_v29 = vmul.f32 0.6931472, %v869_v21 }
0x1444   :  { %v757_v30 = vadd.f32 %v756_v29, %v1076_v49 }
0x1446   :  { %v761_v33 = vsel %vm760_vm6, %v757_v30, %v740_v32 }
0x1447   :  { %v762_v37 = vsub.f32 %v1056_v36, %v761_v33 }
0x1449   :  { %763 = vst [vmem:[%s1106_s2] sm:$0x3] %v762_v37 }
0x144a   :  { %768 = vsyncpa [#allocation3], 1 }

</bundles_post_ra>
